<compile_context>
chip_gen: v7x
topology: tpu7x:2x2x1
jax: 0.10.0
libtpu: 0.0.40
codegen_flags: <defaults>
</compile_context>

<pallas_src>
import functools

import jax
import jax.numpy as jnp
from jax.experimental import pallas as pl
from jax.experimental.pallas import tpu as pltpu


# --------------------------------------------------------------------------
# Pallas kernels: single-step fused matmul + BN epilogue (+ residual) (+ ReLU)
# --------------------------------------------------------------------------
def _mm_kernel(a_ref, b_ref, s_ref, t_ref, o_ref, *, relu):
    acc = jnp.dot(a_ref[...], b_ref[...], preferred_element_type=jnp.float32)
    out = acc * s_ref[...] + t_ref[...]
    if relu:
        out = jnp.maximum(out, 0.0)
    o_ref[...] = out.astype(o_ref.dtype)


def _mm_res_kernel(a_ref, b_ref, s_ref, t_ref, r_ref, o_ref, *, relu):
    acc = jnp.dot(a_ref[...], b_ref[...], preferred_element_type=jnp.float32)
    out = acc * s_ref[...] + t_ref[...] + r_ref[...].astype(jnp.float32)
    if relu:
        out = jnp.maximum(out, 0.0)
    o_ref[...] = out.astype(o_ref.dtype)


# --------------------------------------------------------------------------
# Kernel wrapper
# --------------------------------------------------------------------------
def _round_up(x, m):
    return (x + m - 1) // m * m


def _pad2(x, rows, cols):
    pr, pc = rows - x.shape[0], cols - x.shape[1]
    if pr == 0 and pc == 0:
        return x
    return jnp.pad(x, ((0, pr), (0, pc)))


def matmul_bn_act(a, b, scale, shift, residual=None, relu=False,
                  out_dtype=jnp.bfloat16):
    """out = act((a @ b) * scale + shift [+ residual]).

    a:(M,K), b:(K,N), scale/shift:(N,).  Inputs are streamed as bf16, the MXU
    accumulates in f32 and the epilogue runs in f32.  K is never tiled (largest
    K block here fits VMEM), so there is no accumulator scratch.
    """
    M, K = a.shape
    K2, N = b.shape
    assert K == K2

    # Shape-aware tiling.  M: single block (pad to 16 for bf16 sublane packing)
    # up to 512 rows, else 256-row tiles.  K / N: pad to the 128-lane boundary.
    if M <= 512:
        TM = _round_up(max(M, 1), 16)
        Mp = TM
    else:
        TM = 256
        Mp = _round_up(M, 256)
    Kp = _round_up(K, 128)
    Np = _round_up(N, 128)
    # Cout >= 512: 256-wide output tiles -> >=2 independent blocks for megacore.
    TN = 256 if (Np >= 512 and Np % 256 == 0) else 128

    a_p = _pad2(a.astype(jnp.bfloat16), Mp, Kp)
    b_p = _pad2(b.astype(jnp.bfloat16), Kp, Np)
    s_p = _pad2(scale.reshape(1, N).astype(jnp.float32), 1, Np)
    t_p = _pad2(shift.reshape(1, N).astype(jnp.float32), 1, Np)

    inputs = [a_p, b_p, s_p, t_p]
    in_specs = [
        pl.BlockSpec((TM, Kp), lambda i, j: (i, 0)),
        pl.BlockSpec((Kp, TN), lambda i, j: (0, j)),
        pl.BlockSpec((1, TN), lambda i, j: (0, j)),
        pl.BlockSpec((1, TN), lambda i, j: (0, j)),
    ]

    if residual is not None:
        r_p = _pad2(residual.astype(jnp.bfloat16), Mp, Np)
        inputs.append(r_p)
        in_specs.append(pl.BlockSpec((TM, TN), lambda i, j: (i, j)))
        kernel = functools.partial(_mm_res_kernel, relu=relu)
    else:
        kernel = functools.partial(_mm_kernel, relu=relu)

    out = pl.pallas_call(
        kernel,
        out_shape=jax.ShapeDtypeStruct((Mp, Np), out_dtype),
        grid=(Mp // TM, Np // TN),
        in_specs=in_specs,
        out_specs=pl.BlockSpec((TM, TN), lambda i, j: (i, j)),
        compiler_params=pltpu.CompilerParams(
            dimension_semantics=("parallel", "parallel"),
            vmem_limit_bytes=32 * 1024 * 1024),
    )(*inputs)

    if Mp != M or Np != N:
        out = out[:M, :N]
    return out


# --------------------------------------------------------------------------
# ResNet-18 building blocks (im2col glue in plain JAX, compute in Pallas)
# --------------------------------------------------------------------------
def im2col(x, kh, kw, stride, pad):
    N, H, W, C = x.shape
    Ho = (H + 2 * pad - kh) // stride + 1
    Wo = (W + 2 * pad - kw) // stride + 1
    xp = jnp.pad(x, ((0, 0), (pad, pad), (pad, pad), (0, 0))) if pad else x
    cols = [xp[:, i:i + stride * Ho:stride, j:j + stride * Wo:stride, :]
            for i in range(kh) for j in range(kw)]
    patches = jnp.concatenate(cols, axis=-1)  # (N, Ho, Wo, kh*kw*C)
    return patches.reshape(N * Ho * Wo, kh * kw * C), (N, Ho, Wo)


def conv_bn(x, w, scale, shift, stride, pad, relu, residual=None):
    """conv (no bias) -> folded BN -> (+residual) -> (ReLU). w: (KH,KW,Cin,Cout)."""
    kh, kw, cin, cout = w.shape
    patches, (N, Ho, Wo) = im2col(x, kh, kw, stride, pad)
    wmat = w.reshape(kh * kw * cin, cout)
    res = residual.reshape(N * Ho * Wo, cout) if residual is not None else None
    y = matmul_bn_act(patches, wmat, scale, shift, residual=res, relu=relu,
                      out_dtype=jnp.bfloat16)
    return y.reshape(N, Ho, Wo, cout)


def maxpool_3x3_s2_p1(x):
    """PyTorch MaxPool2d(kernel_size=3, stride=2, padding=1) on NHWC input."""
    N, H, W, C = x.shape
    Ho = (H + 2 - 3) // 2 + 1
    Wo = (W + 2 - 3) // 2 + 1
    xp = jnp.pad(x, ((0, 0), (1, 1), (1, 1), (0, 0)), constant_values=-jnp.inf)
    taps = [xp[:, i:i + 2 * Ho:2, j:j + 2 * Wo:2, :]
            for i in range(3) for j in range(3)]
    return jnp.max(jnp.stack(taps, axis=0), axis=0)


def global_avg_pool(x):
    """AdaptiveAvgPool2d((1,1)) + flatten, NHWC -> (N, C), reduced in f32."""
    return jnp.mean(x.astype(jnp.float32), axis=(1, 2))


def basic_block(x, blk):
    stride = blk['stride']
    if 'down_w' in blk:
        d_s, d_t = blk['down_bn']
        identity = conv_bn(x, blk['down_w'], d_s, d_t, stride=stride, pad=0,
                           relu=False)
    else:
        identity = x
    s1, t1 = blk['bn1']
    out = conv_bn(x, blk['w1'], s1, t1, stride=stride, pad=1, relu=True)
    s2, t2 = blk['bn2']
    # out = relu(bn2(conv2(out)) + identity) -- add + relu fused in the epilogue
    out = conv_bn(out, blk['w2'], s2, t2, stride=1, pad=1, relu=True,
                  residual=identity)
    return out


def resnet18_features(x_nchw, p):
    # NCHW -> NHWC, stream activations as bf16
    x = jnp.transpose(x_nchw, (0, 2, 3, 1)).astype(jnp.bfloat16)
    s, t = p['bn1']
    x = conv_bn(x, p['conv1_w'], s, t, stride=2, pad=3, relu=True)
    x = maxpool_3x3_s2_p1(x)
    for blk in p['blocks']:
        x = basic_block(x, blk)
    return global_avg_pool(x)  # (N, 512) f32


def multitask_resnet18_forward(x, params, task_type):
    features = resnet18_features(x, params)
    if task_type == 'multi-label, binary-class':
        w, bias = params['fc_multi_w'], params['fc_multi_b']
    elif task_type == 'multi-class':
        w, bias = params['fc_single_w'], params['fc_single_b']
    else:
        raise ValueError(f"unknown task_type: {task_type}")
    ones = jnp.ones((w.shape[1],), jnp.float32)
    return matmul_bn_act(features, w, ones, bias, relu=False,
                         out_dtype=jnp.float32)


# --------------------------------------------------------------------------
# Deterministic synthetic parameters (shapes follow torchvision resnet18)
# --------------------------------------------------------------------------
def _bn_fold(key, c):
    k1, k2, k3, k4 = jax.random.split(key, 4)
    gamma = 1.0 + 0.1 * jax.random.normal(k1, (c,), jnp.float32)
    beta = 0.1 * jax.random.normal(k2, (c,), jnp.float32)
    mean = 0.1 * jax.random.normal(k3, (c,), jnp.float32)
    var = jax.random.uniform(k4, (c,), jnp.float32, minval=0.5, maxval=1.5)
    scale = gamma / jnp.sqrt(var + 1e-5)
    shift = beta - mean * scale
    return scale, shift


def _conv_w(key, kh, kw, cin, cout):
    fan_in = kh * kw * cin
    return jax.random.normal(key, (kh, kw, cin, cout), jnp.float32) * (2.0 / fan_in) ** 0.5


def make_params(key, n_classes_mt, n_classes_ml):
    keys = iter(jax.random.split(key, 128))
    p = {'conv1_w': _conv_w(next(keys), 7, 7, 3, 64), 'bn1': _bn_fold(next(keys), 64)}
    stage_cfg = [(64, 64, 1), (64, 128, 2), (128, 256, 2), (256, 512, 2)]
    blocks = []
    for cin, cout, stride in stage_cfg:
        for b in range(2):
            s = stride if b == 0 else 1
            ci = cin if b == 0 else cout
            blk = {'stride': s,
                   'w1': _conv_w(next(keys), 3, 3, ci, cout), 'bn1': _bn_fold(next(keys), cout),
                   'w2': _conv_w(next(keys), 3, 3, cout, cout), 'bn2': _bn_fold(next(keys), cout)}
            if s != 1 or ci != cout:
                blk['down_w'] = _conv_w(next(keys), 1, 1, ci, cout)
                blk['down_bn'] = _bn_fold(next(keys), cout)
            blocks.append(blk)
    p['blocks'] = blocks
    in_features = 512
    p['fc_single_w'] = jax.random.normal(next(keys), (in_features, n_classes_mt), jnp.float32) / in_features ** 0.5
    p['fc_single_b'] = 0.01 * jax.random.normal(next(keys), (n_classes_mt,), jnp.float32)
    p['fc_multi_w'] = jax.random.normal(next(keys), (in_features, n_classes_ml), jnp.float32) / in_features ** 0.5
    p['fc_multi_b'] = 0.01 * jax.random.normal(next(keys), (n_classes_ml,), jnp.float32)
    return p


# --------------------------------------------------------------------------
if __name__ == "__main__":
    key = jax.random.PRNGKey(0)
    pkey, xkey, ckey = jax.random.split(key, 3)
    n_classes_mt, n_classes_ml = 9, 14
    params = make_params(pkey, n_classes_mt, n_classes_ml)

    # Lightweight numerical self-check of the fused matmul kernel vs plain JAX.
    ka, kb, ks, kt = jax.random.split(ckey, 4)
    a_c = jax.random.normal(ka, (37, 147), jnp.float32)
    b_c = jax.random.normal(kb, (147, 64), jnp.float32)
    s_c = 1.0 + 0.1 * jax.random.normal(ks, (64,), jnp.float32)
    t_c = 0.1 * jax.random.normal(kt, (64,), jnp.float32)
    got = matmul_bn_act(a_c, b_c, s_c, t_c, relu=True,
                        out_dtype=jnp.float32)
    ref = jnp.maximum(
        jnp.dot(a_c.astype(jnp.bfloat16).astype(jnp.float32),
                b_c.astype(jnp.bfloat16).astype(jnp.float32)) * s_c + t_c, 0.0)
    assert bool(jnp.all(jnp.abs(got - ref) <= 0.3 + 0.03 * jnp.abs(ref)))

    # PyTorch-style NCHW input; 32x32 so the /32 downsampling of ResNet-18 works.
    x = jax.random.normal(xkey, (2, 3, 32, 32), jnp.float32)

    fwd_mc = jax.jit(lambda inp: multitask_resnet18_forward(inp, params, 'multi-class'))
    fwd_ml = jax.jit(lambda inp: multitask_resnet18_forward(inp, params, 'multi-label, binary-class'))

    out_mc = jax.block_until_ready(fwd_mc(x))
    out_ml = jax.block_until_ready(fwd_ml(x))

    assert out_mc.shape == (2, n_classes_mt) and out_mc.dtype == jnp.float32
    assert out_ml.shape == (2, n_classes_ml) and out_ml.dtype == jnp.float32
    assert bool(jnp.all(jnp.isfinite(out_mc))) and bool(jnp.all(jnp.isfinite(out_ml)))
    print("KERNEL_OK")
</pallas_src>

<mosaic_0001>
module attributes {stable_mosaic.version = 11 : i64} {
  func.func @_mm_kernel(%arg0: i32, %arg1: i32, %arg2: memref<48x256xbf16, #tpu.memory_space<vmem>>, %arg3: memref<256x128xbf16, #tpu.memory_space<vmem>>, %arg4: memref<1x128xf32, #tpu.memory_space<vmem>>, %arg5: memref<1x128xf32, #tpu.memory_space<vmem>>, %arg6: memref<48x128xf32, #tpu.memory_space<vmem>>) attributes {dimension_semantics = [#tpu.dimension_semantics<parallel>, #tpu.dimension_semantics<parallel>], iteration_bounds = array<i64: 1, 1>, scalar_prefetch = 0 : i64, scratch_operands = 0 : i64, tpu.core_type = #tpu.core_type<tc>, window_params = [{transform_indices = @transform_0, window_bounds = array<i64: 48, 256>}, {transform_indices = @transform_1, window_bounds = array<i64: 256, 128>}, {transform_indices = @transform_2, window_bounds = array<i64: 1, 128>}, {transform_indices = @transform_3, window_bounds = array<i64: 1, 128>}, {transform_indices = @transform_4, window_bounds = array<i64: 48, 128>}]} {
    %c0 = arith.constant 0 : index
    %c0_0 = arith.constant 0 : index
    %0 = vector.load %arg2[%c0, %c0_0] : memref<48x256xbf16, #tpu.memory_space<vmem>>, vector<48x256xbf16>
    %c0_1 = arith.constant 0 : index
    %c0_2 = arith.constant 0 : index
    %1 = vector.load %arg3[%c0_1, %c0_2] : memref<256x128xbf16, #tpu.memory_space<vmem>>, vector<256x128xbf16>
    %cst = arith.constant dense<0.000000e+00> : vector<48x128xf32>
    %2 = tpu.matmul %0, %1, %cst {dimension_numbers = #tpu.dot_dimension_numbers<[1], [0], [0], [1], [0, 0, 1, 1], [], []>} : vector<48x256xbf16>, vector<256x128xbf16>, vector<48x128xf32> -> vector<48x128xf32>
    %c0_3 = arith.constant 0 : index
    %c0_4 = arith.constant 0 : index
    %3 = vector.load %arg4[%c0_3, %c0_4] : memref<1x128xf32, #tpu.memory_space<vmem>>, vector<1x128xf32>
    %4 = vector.broadcast %3 : vector<1x128xf32> to vector<48x128xf32>
    %5 = arith.mulf %2, %4 : vector<48x128xf32>
    %c0_5 = arith.constant 0 : index
    %c0_6 = arith.constant 0 : index
    %6 = vector.load %arg5[%c0_5, %c0_6] : memref<1x128xf32, #tpu.memory_space<vmem>>, vector<1x128xf32>
    %7 = vector.broadcast %6 : vector<1x128xf32> to vector<48x128xf32>
    %8 = arith.addf %5, %7 : vector<48x128xf32>
    %cst_7 = arith.constant 0.000000e+00 : f32
    %9 = vector.broadcast %cst_7 : f32 to vector<48x128xf32>
    %10 = arith.maximumf %8, %9 : vector<48x128xf32>
    %c0_8 = arith.constant 0 : index
    %c0_9 = arith.constant 0 : index
    %11 = vector.load %arg6[%c0_8, %c0_9] : memref<48x128xf32, #tpu.memory_space<vmem>>, vector<48x128xf32>
    tpu.vector_store %arg6[%c0_8, %c0_9], %10 {strides = array<i32>} : memref<48x128xf32, #tpu.memory_space<vmem>>, vector<48x128xf32>,
    return
  }
  func.func @transform_0(%arg0: i32, %arg1: i32) -> (i32, i32) {
    %c0_i32 = arith.constant 0 : i32
    %c0_i32_0 = arith.constant 0 : i32
    return %arg0, %c0_i32 : i32, i32
  }
  func.func @transform_1(%arg0: i32, %arg1: i32) -> (i32, i32) {
    %c0_i32 = arith.constant 0 : i32
    %c0_i32_0 = arith.constant 0 : i32
    return %c0_i32, %arg1 : i32, i32
  }
  func.func @transform_2(%arg0: i32, %arg1: i32) -> (i32, i32) {
    %c0_i32 = arith.constant 0 : i32
    %c0_i32_0 = arith.constant 0 : i32
    return %c0_i32, %arg1 : i32, i32
  }
  func.func @transform_3(%arg0: i32, %arg1: i32) -> (i32, i32) {
    %c0_i32 = arith.constant 0 : i32
    %c0_i32_0 = arith.constant 0 : i32
    return %c0_i32, %arg1 : i32, i32
  }
  func.func @transform_4(%arg0: i32, %arg1: i32) -> (i32, i32) {
    %c0_i32 = arith.constant 0 : i32
    return %arg0, %arg1 : i32, i32
  }
}

</mosaic_0001>

<bundles_post_ra>
// kernel: tpu_custom_call.1
= control target key start
LH: loop header
LB: loop body
LE: loop exit
PB: predicated region body
PF: predicated region fallthrough
CT: control target
= control target key end

     0   :  { %9 = vsyncpa [#allocation3], 0  ;;  %s582_s0 = inlined_call_operand.hbm [shape: bf16[48,256], index: 0, kind: input, shape index: {}]   ;;  %s583_s1 = inlined_call_operand.hbm [shape: bf16[256,128], index: 1, kind: input, shape index: {}]   ;;  %s584_s2 = inlined_call_operand.vmem [shape: f32[1,128], index: 2, kind: input, shape index: {}]   ;;  %s585_s3 = inlined_call_operand.vmem [shape: f32[1,128], index: 3, kind: input, shape index: {}]   ;;  %s586_s4 = inlined_call_operand.hbm [shape: f32[48,128], index: 4, kind: output, shape index: {}]  }
   0x1   :  { %10 = vsyncpa [#allocation6], 0 }
   0x2   :  { %11 = vsyncpa [#allocation4], 0  ;;  %s502_s15 = smov [#allocation2]   ;;  %s430_s19 = scalar_lea.hbm %s582_s0, 768 }
   0x3   :  { %s17_s16 = sshll.u32 %s502_s15, 4  ;;  %p431_p0 = scmp.ne.s32.totalorder %s582_s0, %s430_s19  ;;  %s18_s16 = int_to_ptr.vmem [resolvable:$true] %s17_s16 }
   0x4   :  { %p434_p1 = scmp.lt.u32.totalorder %s430_s19, %s582_s0 }
   0x6   :  { %p436_p2 = pnand %p434_p1, %p431_p0 }
   0x8   :  { %439 = shalt.err (!%p436_p2)
}
   0x9   :  { %s440_s24 = scalar_lea.vmem %s18_s16, 768  ;;  %p445_p4 = scmp.lt.s32.totalorder %s18_s16, %s18_s16 }
   0xa   :  { %p441_p3 = scmp.ne.s32.totalorder %s18_s16, %s440_s24  ;;  %p446_p5 = scmp.lt.s32.totalorder %s440_s24, %s440_s24 }
   0xc   :  { %p447_p6 = por %p446_p5, %p445_p4 }
   0xe   :  { %p448_p7 = pnand %p447_p6, %p441_p3 }
  0x10   :  { %451 = shalt.err (!%p448_p7)
}
  0x11   :  { %s503_s25 = smov 128   ;;  %s504_s26 = smov 8  }
  0x12   :  { %23 = dma.hbm_to_vmem [thread:$0]  %s582_s0, 768, %s18_s16, [#allocation3], %s503_s25, %s503_s25, %s504_s26  }
  0x13   :  { %s505_s29 = smov [#allocation5]   ;;  %s452_s7 = scalar_lea.hbm %s583_s1, 2048 }
  0x14   :  { %s29_s30 = sshll.u32 %s505_s29, 4  ;;  %p453_p8 = scmp.ne.s32.totalorder %s583_s1, %s452_s7  ;;  %s30_s30 = int_to_ptr.vmem [resolvable:$true] %s29_s30 }
  0x15   :  { %p456_p9 = scmp.lt.u32.totalorder %s452_s7, %s583_s1 }
  0x17   :  { %p458_p10 = pnand %p456_p9, %p453_p8 }
  0x19   :  { %461 = shalt.err (!%p458_p10)
}
  0x1a   :  { %s462_s12 = scalar_lea.vmem %s30_s30, 2048  ;;  %p467_p12 = scmp.lt.s32.totalorder %s30_s30, %s30_s30 }
  0x1b   :  { %p463_p11 = scmp.ne.s32.totalorder %s30_s30, %s462_s12  ;;  %p468_p13 = scmp.lt.s32.totalorder %s462_s12, %s462_s12 }
  0x1d   :  { %p469_p0 = por %p468_p13, %p467_p12 }
  0x1f   :  { %p470_p1 = pnand %p469_p0, %p463_p11 }
  0x21   :  { %473 = shalt.err (!%p470_p1)
}
  0x22   :  { %s506_s0 = smov 64   ;;  %s507_s13 = smov 4  }
  0x23   :  { %35 = dma.hbm_to_vmem [thread:$0]  %s583_s1, 2048, %s30_s30, [#allocation6], %s506_s0, %s506_s0, %s507_s13  }
  0x24   :  { %496 = dma.done.wait [#allocation3], 768  }
  0x25   :  { %497 = vsyncadd [#allocation3], 4294966528 }
  0x26   :  { %498 = dma.done.wait [#allocation6], 2048  }
  0x27   :  { %499 = vsyncadd [#allocation6], 4294965248  ;;  %v405_v0 = vld [vmem:[#allocation5 + $0x40] sm:$0xff]   ;;  %v407_v2 = vld [vmem:[#allocation5 + $0x48] sm:$0xff]  }
  0x28   :  { %v406_v1 = vld [vmem:[#allocation5] sm:$0xff]   ;;  %382 = vmatprep.subr.bf16.mxu1 %v405_v0  ;;  %348 = vmatprep.subr.bf16.mxu0 %v405_v0  ;;  %v408_v3 = vld [vmem:[#allocation5 + $0x8] sm:$0xff]   ;;  %v409_v4 = vld [vmem:[#allocation5 + $0x50] sm:$0xff]  }
  0x29   :  { %390 = vmatpush3.bf16.msra.mxu1 %v406_v1  ;;  %349 = vmatpush3.bf16.msra.mxu0 %v406_v1  ;;  %v410_v5 = vld [vmem:[#allocation5 + $0x10] sm:$0xff]   ;;  %v411_v6 = vld [vmem:[#allocation5 + $0x58] sm:$0xff]   ;;  %v413_v8 = vld [vmem:[#allocation5 + $0x60] sm:$0xff]  }
  0x2a   :  { %383 = vmatprep.subr.bf16.mxu1 %v407_v2  ;;  %350 = vmatprep.subr.bf16.mxu0 %v407_v2  ;;  %v412_v7 = vld [vmem:[#allocation5 + $0x18] sm:$0xff]   ;;  %v414_v9 = vld [vmem:[#allocation5 + $0x20] sm:$0xff]   ;;  %v415_v10 = vld [vmem:[#allocation5 + $0x68] sm:$0xff]  }
  0x2b   :  { %v423_v11 = vld [vmem:[#allocation2 + $0x14] ss:$8 sps:$4 sm:$0xff]   ;;  %v426_v12 = vld [vmem:[#allocation2 + $0x4] ss:$8 sps:$4 sm:$0xff]   ;;  %v421_v18 = vld [vmem:[#allocation2 + $0x10] ss:$8 sps:$4 sm:$0xff]  }
  0x2c   :  { %v416_v13 = vld [vmem:[#allocation5 + $0x28] sm:$0xff]   ;;  %v417_v14 = vld [vmem:[#allocation5 + $0x70] sm:$0xff]   ;;  %251 = vmatprep.mubr.bf16.mxu1 %v423_v11  ;;  %243 = vmatprep.mubr.bf16.mxu0 %v426_v12  ;;  %v419_v16 = vld [vmem:[#allocation5 + $0x78] sm:$0xff]  }
  0x2d   :  { %391 = vmatpush3.bf16.msra.mxu1 %v408_v3  ;;  %351 = vmatpush3.bf16.msra.mxu0 %v408_v3  ;;  %v418_v15 = vld [vmem:[#allocation5 + $0x30] sm:$0xff]   ;;  %v420_v17 = vld [vmem:[#allocation5 + $0x38] sm:$0xff]  }
  0x2e   :  { %384 = vmatprep.subr.bf16.mxu1 %v409_v4  ;;  %352 = vmatprep.subr.bf16.mxu0 %v409_v4  ;;  %v424_v19 = vld [vmem:[#allocation2] ss:$8 sps:$4 sm:$0xff]   ;;  %v427_v20 = vld [vmem:[#allocation2 + $0x24] ss:$8 sps:$4 sm:$0xff]  }
  0x2f   :  { %v429_v21 = vld [vmem:[#allocation2 + $0x20] ss:$8 sps:$4 sm:$0xff]  }
  0x30   :  { %v346_v25 = vld [vmem:[%s584_s2] ss:$0 sm:$0xff]  ;;  %s508_s2 = smov [#allocation7]  }
  0x31   :  { %392 = vmatpush3.bf16.msra.mxu1 %v410_v5  ;;  %353 = vmatpush3.bf16.msra.mxu0 %v410_v5  ;;  %v347_v31 = vld [vmem:[%s585_s3] ss:$0 sm:$0xff]  ;;  %s311_s3 = sshll.u32 %s508_s2, 4  ;;  %s312_s3 = int_to_ptr.vmem [resolvable:$true] %s311_s3 }
  0x32   :  { %385 = vmatprep.subr.bf16.mxu1 %v411_v6  ;;  %354 = vmatprep.subr.bf16.mxu0 %v411_v6  ;;  %s474_s19 = scalar_lea.vmem %s312_s3, 768  ;;  %p479_p3 = scmp.lt.s32.totalorder %s312_s3, %s312_s3 }
  0x33   :  { %p475_p2 = scmp.ne.s32.totalorder %s312_s3, %s474_s19  ;;  %p480_p4 = scmp.lt.s32.totalorder %s474_s19, %s474_s19 }
  0x35   :  { %393 = vmatpush3.bf16.msra.mxu1 %v412_v7  ;;  %355 = vmatpush3.bf16.msra.mxu0 %v412_v7  ;;  %p481_p5 = por %p480_p4, %p479_p3 }
  0x36   :  { %386 = vmatprep.subr.bf16.mxu1 %v413_v8  ;;  %356 = vmatprep.subr.bf16.mxu0 %v413_v8 }
  0x37   :  { %p482_p6 = pnand %p481_p5, %p475_p2 }
  0x39   :  { %394 = vmatpush3.bf16.msra.mxu1 %v414_v9  ;;  %357 = vmatpush3.bf16.msra.mxu0 %v414_v9 }
  0x3a   :  { %387 = vmatprep.subr.bf16.mxu1 %v415_v10  ;;  %358 = vmatprep.subr.bf16.mxu0 %v415_v10 }
  0x3d   :  { %395 = vmatpush3.bf16.msra.mxu1 %v416_v13  ;;  %359 = vmatpush3.bf16.msra.mxu0 %v416_v13 }
  0x3e   :  { %388 = vmatprep.subr.bf16.mxu1 %v417_v14  ;;  %360 = vmatprep.subr.bf16.mxu0 %v417_v14 }
  0x41   :  { %396 = vmatpush3.bf16.msra.mxu1 %v418_v15  ;;  %361 = vmatpush3.bf16.msra.mxu0 %v418_v15 }
  0x42   :  { %389 = vmatprep.subr.bf16.mxu1 %v419_v16  ;;  %362 = vmatprep.subr.bf16.mxu0 %v419_v16 }
  0x45   :  { %397 = vmatpush3.bf16.msra.mxu1 %v420_v17  ;;  %363 = vmatpush3.bf16.msra.mxu0 %v420_v17 }
  0x48   :  { %252 = vmatmul.mubr.bf16.vlgmr.msra.gmra.mrb[0].mxu1 %v421_v18  ;;  %244 = vmatmul.mubr.bf16.vlgmr.msra.gmra.mrb[0].mxu0 %v424_v19 }
  0x49   :  { %259 = vmatprep.mubr.bf16.mxu1 %v427_v20 }
  0x50   :  { %260 = vmatmul.mubr.bf16.gmra.mrb[4].mxu1 %v429_v21 }
 0x11b   :  { %v370_v22 = vpop.f32.mrb[0].mxu1  ;;  %v364_v23 = vpop.f32.mrb[0].mxu0 }
 0x11c   :  { %v371_v24 = vpop.f32.mrb[1].mxu1  ;;  %v365_v26 = vpop.f32.mrb[1].mxu0 }
 0x11d   :  { %v372_v27 = vadd.f32 %v371_v24, %v370_v22  ;;  %v373_v28 = vpop.f32.mrb[2].mxu1  ;;  %v366_v29 = vadd.f32 %v365_v26, %v364_v23  ;;  %v367_v30 = vpop.f32.mrb[2].mxu0 }
 0x11e   :  { %v374_v32 = vpop.f32.mrb[3].mxu1  ;;  %v368_v33 = vpop.f32.mrb[3].mxu0 }
 0x11f   :  { %v277_v34 = vmul.f32 %v372_v27, %v346_v25  ;;  %v375_v35 = vadd.f32 %v374_v32, %v373_v28  ;;  %v275_v36 = vmul.f32 %v366_v29, %v346_v25  ;;  %v369_v37 = vadd.f32 %v368_v33, %v367_v30 }
 0x121   :  { %v290_v38 = vadd.f32 %v347_v31, %v277_v34  ;;  %v278_v39 = vmul.f32 %v375_v35, %v346_v25  ;;  %v288_v40 = vadd.f32 %v347_v31, %v275_v36  ;;  %v276_v41 = vmul.f32 %v369_v37, %v346_v25 }
 0x123   :  { %v296_v42 = vmax.f32 %v290_v38, 0.0  ;;  %v291_v43 = vadd.f32 %v347_v31, %v278_v39  ;;  %v294_v44 = vmax.f32 %v288_v40, 0.0  ;;  %v289_v45 = vadd.f32 %v347_v31, %v276_v41  ;;  %v376_v46 = vpop.f32.mrb[4].mxu1 }
 0x124   :  { %v377_v47 = vpop.f32.mrb[5].mxu1 }
 0x125   :  { %302 = vst [vmem:[#allocation7 + $0x10] sm:$0xff] %v296_v42  ;;  %v297_v48 = vmax.f32 %v291_v43, 0.0  ;;  %300 = vst [vmem:[#allocation7] sm:$0xff] %v294_v44  ;;  %v295_v49 = vmax.f32 %v289_v45, 0.0  ;;  %v378_v50 = vadd.f32 %v377_v47, %v376_v46  ;;  %v379_v51 = vpop.f32.mrb[6].mxu1 }
 0x126   :  { %v380_v52 = vpop.f32.mrb[7].mxu1 }
 0x127   :  { %303 = vst [vmem:[#allocation7 + $0x18] sm:$0xff] %v297_v48  ;;  %301 = vst [vmem:[#allocation7 + $0x8] sm:$0xff] %v295_v49  ;;  %v279_v53 = vmul.f32 %v378_v50, %v346_v25  ;;  %v381_v54 = vadd.f32 %v380_v52, %v379_v51 }
 0x129   :  { %v292_v55 = vadd.f32 %v347_v31, %v279_v53  ;;  %v280_v56 = vmul.f32 %v381_v54, %v346_v25 }
 0x12b   :  { %v298_v57 = vmax.f32 %v292_v55, 0.0  ;;  %v293_v58 = vadd.f32 %v347_v31, %v280_v56 }
 0x12d   :  { %304 = vst [vmem:[#allocation7 + $0x20] sm:$0xff] %v298_v57  ;;  %v299_v59 = vmax.f32 %v293_v58, 0.0 }
 0x12f   :  { %305 = vst [vmem:[#allocation7 + $0x28] sm:$0xff] %v299_v59 }
 0x130   :  { %485 = shalt.err (!%p482_p6)
}
 0x131   :  { %s486_s22 = scalar_lea.hbm %s586_s4, 768 }
 0x132   :  { %p487_p7 = scmp.ne.s32.totalorder %s586_s4, %s486_s22  ;;  %p490_p8 = scmp.lt.u32.totalorder %s486_s22, %s586_s4 }
 0x134   :  { %p492_p9 = pnand %p490_p8, %p487_p7 }
 0x136   :  { %495 = shalt.err (!%p492_p9)
}
 0x137   :  { %317 = dma.vmem_to_hbm [thread:$0]  %s312_s3, 768, %s586_s4, [#allocation4], %s503_s25, %s503_s25, %s504_s26  }
 0x138   :  { %500 = dma.done.wait [#allocation4], 768  }
 0x139   :  { %501 = vsyncadd [#allocation4], 4294966528 }
 0x13a   :  { %321 = vsyncpa [#allocation3], 1 }
 0x13b   :  { %322 = vsyncpa [#allocation6], 1 }
 0x13c   :  { %323 = vsyncpa [#allocation4], 1 }

</bundles_post_ra>
